<compile_context>
chip_gen: v7x
topology: tpu7x:2x2x1
jax: 0.10.0
libtpu: 0.0.40
codegen_flags: <defaults>
</compile_context>

<pallas_src>
import functools

import jax
import jax.numpy as jnp
from jax.experimental import pallas as pl
from jax.experimental.pallas import tpu as pltpu


def _round_up(x, m):
    return ((x + m - 1) // m) * m


def vae_mlp_kernel(
    x_ref,       # (TB, D)        f32
    wenc_ref,    # (D, 2L)        bf16   fused hidden1 -> [mu | logvar]
    benc_ref,    # (1, 2L)        f32
    wfc1_ref,    # (L, H)         bf16
    bfc1_ref,    # (1, H)         f32
    wfc2_ref,    # (H, D)         bf16
    bfc2_ref,    # (1, D)         f32
    eps_ref,     # (TB, L)        f32
    out_ref,     # (TB, OUT_PAD)  f32    packed [x_hat | mu | logvar | 0-pad]
    *,
    input_dims: int,
    latent_dims: int,
):
    D = input_dims
    L = latent_dims

    x = x_ref[...]

    # ---- fused encoder: one (TB, 2L) matmul, then slice mu / logvar ----
    ml = jnp.dot(x.astype(jnp.bfloat16), wenc_ref[...],
                 preferred_element_type=jnp.float32) + benc_ref[...]
    mu = ml[:, :L]
    logvar = ml[:, L:]

    # ---- reparameterize (f32 elementwise): z = mu + exp(0.5*logvar)*eps ----
    std = jnp.exp(0.5 * logvar)
    z = mu + std * eps_ref[...]

    # ---- decode: relu(fc1(z)) -> fc2 ----
    d = jnp.dot(z.astype(jnp.bfloat16), wfc1_ref[...],
                preferred_element_type=jnp.float32) + bfc1_ref[...]
    d = jnp.maximum(d, 0.0)
    x_hat = jnp.dot(d.astype(jnp.bfloat16), wfc2_ref[...],
                    preferred_element_type=jnp.float32) + bfc2_ref[...]

    # ---- single lane-dense store of the packed output slab ----
    rows = x.shape[0]
    pad_cols = out_ref.shape[1] - (D + 2 * L)
    pieces = [x_hat, mu, logvar]
    if pad_cols > 0:
        pieces.append(jnp.zeros((rows, pad_cols), jnp.float32))
    out_ref[...] = jnp.concatenate(pieces, axis=-1).astype(out_ref.dtype)


def prepare_params(params):
    """One-time parameter prep (call once, reuse every forward).

    Fuses the activation-free hidden1 layer into the mu/logvar projection
    (product computed in f32, cast to bf16 once), transposes PyTorch
    (out, in) decoder weights to (in, out) bf16, and reshapes biases to
    (1, out) f32 for lane broadcast.
    """
    w1_t = params["hidden1_w"].T.astype(jnp.float32)                 # (D, H)
    b1 = params["hidden1_b"].astype(jnp.float32)                     # (H,)
    wml_t = jnp.concatenate(
        [params["mu_w"].T, params["logvar_w"].T], axis=1).astype(jnp.float32)   # (H, 2L)
    bml = jnp.concatenate(
        [params["mu_b"], params["logvar_b"]]).astype(jnp.float32)               # (2L,)

    w_enc = jnp.dot(w1_t, wml_t).astype(jnp.bfloat16)                # (D, 2L)
    b_enc = (jnp.dot(b1, wml_t) + bml).reshape(1, -1)                # (1, 2L) f32

    wfc1 = params["fc1_w"].T.astype(jnp.bfloat16)                    # (L, H)
    bfc1 = params["fc1_b"].reshape(1, -1).astype(jnp.float32)
    wfc2 = params["fc2_w"].T.astype(jnp.bfloat16)                    # (H, D)
    bfc2 = params["fc2_b"].reshape(1, -1).astype(jnp.float32)
    return (w_enc, b_enc, wfc1, bfc1, wfc2, bfc2)


def _weight_bytes(prepped):
    return int(sum(a.size * a.dtype.itemsize for a in prepped))


def _pick_batch_tile(batch, input_dims, latent_dims, out_pad, weight_bytes,
                     *, vmem_budget_bytes=24 << 20, max_tile=512):
    """VMEM-aware batch tile: fit 2x-double-buffered streamed blocks plus the
    (also 2x-buffered) resident weights inside a conservative scoped budget;
    ensure >= 2 grid steps for big batches (v7x 2-TC sharding)."""
    # f32 bytes per batch row for the streamed blocks (x, eps, packed out),
    # each double-buffered by the default pipeline.
    per_row = 2 * 4 * (input_dims + latent_dims + out_pad)
    avail = max(vmem_budget_bytes - 2 * weight_bytes, 64 * 1024)
    tile = min(max_tile, batch, avail // per_row)
    tile = max(8, (tile // 8) * 8)            # sublane-aligned
    if batch > 256:
        # Split the batch across at least 2 grid steps so the "parallel" axis
        # can shard across v7x's two TensorCores (no effect on v5e/v6e).
        tile = min(tile, _round_up(pl.cdiv(batch, 2), 8))
    return tile


def vae_mlp_forward_packed(x, prepped, eps, *, batch_tile=None):
    """Hot-path API: returns the packed (B, out_pad) f32 slab
    [x_hat | mu | logvar | 0-pad] with no wrapper-side column slices."""
    B, D = x.shape
    w_enc, b_enc, wfc1, bfc1, wfc2, bfc2 = prepped
    L = eps.shape[1]
    assert w_enc.shape == (D, 2 * L)

    out_cols = D + 2 * L
    out_pad = _round_up(out_cols, 128)        # lane-dense output slab

    weight_bytes = _weight_bytes(prepped)
    if batch_tile is None:
        batch_tile = _pick_batch_tile(B, D, L, out_pad, weight_bytes)

    # Ragged batches: zero-pad rows up to a tile multiple, slice off after.
    B_pad = _round_up(max(B, batch_tile), batch_tile)
    if B_pad != B:
        x = jnp.pad(x, ((0, B_pad - B), (0, 0)))
        eps = jnp.pad(eps, ((0, B_pad - B), (0, 0)))
    grid = (B_pad // batch_tile,)

    kernel = functools.partial(vae_mlp_kernel, input_dims=D, latent_dims=L)

    def resident(shape):
        # Full-array block re-used at every grid step (weights / biases).
        return pl.BlockSpec(shape, lambda i: (0, 0))

    in_specs = [
        pl.BlockSpec((batch_tile, D), lambda i: (i, 0)),   # x
        resident(w_enc.shape), resident(b_enc.shape),
        resident(wfc1.shape), resident(bfc1.shape),
        resident(wfc2.shape), resident(bfc2.shape),
        pl.BlockSpec((batch_tile, L), lambda i: (i, 0)),   # eps
    ]
    out_spec = pl.BlockSpec((batch_tile, out_pad), lambda i: (i, 0))

    # Explicit scoped-VMEM limit: covers the double-buffered working set with
    # margin (v5e default scoped limit is only 16 MiB; v7x physical is 64 MiB).
    est_vmem = (2 * weight_bytes
                + 2 * 4 * batch_tile * (D + L + out_pad))
    vmem_limit = int(min(48 << 20, max(32 << 20, est_vmem + (4 << 20))))

    packed = pl.pallas_call(
        kernel,
        out_shape=jax.ShapeDtypeStruct((B_pad, out_pad), jnp.float32),
        grid=grid,
        in_specs=in_specs,
        out_specs=out_spec,
        compiler_params=pltpu.CompilerParams(
            dimension_semantics=("parallel",),
            vmem_limit_bytes=vmem_limit,
        ),
    )(x, w_enc, b_enc, wfc1, bfc1, wfc2, bfc2, eps)

    if B_pad != B:
        packed = packed[:B]
    return packed


def unpack_outputs(packed, input_dims, latent_dims):
    D, L = input_dims, latent_dims
    return packed[:, :D], packed[:, D:D + L], packed[:, D + L:D + 2 * L]


def vae_mlp_forward(x, prepped, eps, *, batch_tile=None):
    """PyTorch-contract API: (x_hat, mu, logvar).  Note the unpack emits three
    HBM column slices; performance-sensitive consumers should use
    vae_mlp_forward_packed and read directly from the packed slab."""
    D = x.shape[1]
    L = eps.shape[1]
    packed = vae_mlp_forward_packed(x, prepped, eps, batch_tile=batch_tile)
    return unpack_outputs(packed, D, L)


def init_params(key, input_dims, hidden_dims, latent_dims):
    """Deterministic synthetic parameters, PyTorch nn.Linear shape convention."""
    ks = jax.random.split(key, 10)

    def lin(kw, kb, out_d, in_d):
        bound = 1.0 / jnp.sqrt(in_d)
        w = jax.random.uniform(kw, (out_d, in_d), jnp.float32, -bound, bound)
        b = jax.random.uniform(kb, (out_d,), jnp.float32, -bound, bound)
        return w, b

    p = {}
    p["hidden1_w"], p["hidden1_b"] = lin(ks[0], ks[1], hidden_dims, input_dims)
    p["mu_w"], p["mu_b"] = lin(ks[2], ks[3], latent_dims, hidden_dims)
    p["logvar_w"], p["logvar_b"] = lin(ks[4], ks[5], latent_dims, hidden_dims)
    p["fc1_w"], p["fc1_b"] = lin(ks[6], ks[7], hidden_dims, latent_dims)
    p["fc2_w"], p["fc2_b"] = lin(ks[8], ks[9], input_dims, hidden_dims)
    return p


def reference_forward(x, params, eps):
    """Pure-JAX f32 reference mirroring the PyTorch module exactly."""
    h = x @ params["hidden1_w"].T + params["hidden1_b"]
    mu = h @ params["mu_w"].T + params["mu_b"]
    logvar = h @ params["logvar_w"].T + params["logvar_b"]
    z = mu + jnp.exp(0.5 * logvar) * eps
    d = jnp.maximum(z @ params["fc1_w"].T + params["fc1_b"], 0.0)
    x_hat = d @ params["fc2_w"].T + params["fc2_b"]
    return x_hat, mu, logvar


if __name__ == "__main__":
    # Small shapes consistent with the module: flat vector input.
    batch = 8
    input_dims = 64
    hidden_dims = 32
    latent_dims = 16

    key = jax.random.PRNGKey(0)
    k_x, k_p, k_eps = jax.random.split(key, 3)

    x = jax.random.normal(k_x, (batch, input_dims), jnp.float32)
    params = init_params(k_p, input_dims, hidden_dims, latent_dims)
    eps = jax.random.normal(k_eps, (batch, latent_dims), jnp.float32)

    # One-time parameter prep (out of the per-call hot path).
    prepped = prepare_params(params)

    # Hot-path call: packed lane-dense slab, no wrapper-side column slices.
    packed = vae_mlp_forward_packed(x, prepped, eps)
    jax.block_until_ready(packed)

    # Unpack once for the correctness check (not the hot path).
    x_hat, mu, logvar = unpack_outputs(packed, input_dims, latent_dims)

    # Sanity check against the exact f32 PyTorch-semantics reference.  The
    # kernel uses bf16 MXU operands (f32 accumulation) and a pre-fused
    # encoder weight, so allow a modest tolerance.
    r_xhat, r_mu, r_logvar = reference_forward(x, params, eps)
    assert x_hat.shape == (batch, input_dims)
    assert mu.shape == (batch, latent_dims)
    assert logvar.shape == (batch, latent_dims)
    assert jnp.allclose(x_hat, r_xhat, atol=3e-2, rtol=3e-2)
    assert jnp.allclose(mu, r_mu, atol=3e-2, rtol=3e-2)
    assert jnp.allclose(logvar, r_logvar, atol=3e-2, rtol=3e-2)

    print("KERNEL_OK")
</pallas_src>

<mosaic_0001>
module attributes {stable_mosaic.version = 11 : i64} {
  func.func @vae_mlp_kernel(%arg0: i32, %arg1: memref<8x64xf32, #tpu.memory_space<vmem>>, %arg2: memref<64x32xbf16, #tpu.memory_space<vmem>>, %arg3: memref<1x32xf32, #tpu.memory_space<vmem>>, %arg4: memref<16x32xbf16, #tpu.memory_space<vmem>>, %arg5: memref<1x32xf32, #tpu.memory_space<vmem>>, %arg6: memref<32x64xbf16, #tpu.memory_space<vmem>>, %arg7: memref<1x64xf32, #tpu.memory_space<vmem>>, %arg8: memref<8x16xf32, #tpu.memory_space<vmem>>, %arg9: memref<8x128xf32, #tpu.memory_space<vmem>>) attributes {dimension_semantics = [#tpu.dimension_semantics<parallel>], iteration_bounds = array<i64: 1>, scalar_prefetch = 0 : i64, scratch_operands = 0 : i64, tpu.core_type = #tpu.core_type<tc>, window_params = [{transform_indices = @transform_0, window_bounds = array<i64: 8, 64>}, {pipeline_mode = #tpu.pipeline_mode<synchronous>, transform_indices = @transform_1, window_bounds = array<i64: 64, 32>}, {pipeline_mode = #tpu.pipeline_mode<synchronous>, transform_indices = @transform_2, window_bounds = array<i64: 1, 32>}, {pipeline_mode = #tpu.pipeline_mode<synchronous>, transform_indices = @transform_3, window_bounds = array<i64: 16, 32>}, {pipeline_mode = #tpu.pipeline_mode<synchronous>, transform_indices = @transform_4, window_bounds = array<i64: 1, 32>}, {pipeline_mode = #tpu.pipeline_mode<synchronous>, transform_indices = @transform_5, window_bounds = array<i64: 32, 64>}, {pipeline_mode = #tpu.pipeline_mode<synchronous>, transform_indices = @transform_6, window_bounds = array<i64: 1, 64>}, {transform_indices = @transform_7, window_bounds = array<i64: 8, 16>}, {transform_indices = @transform_8, window_bounds = array<i64: 8, 128>}]} {
    %c0 = arith.constant 0 : index
    %c0_0 = arith.constant 0 : index
    %0 = vector.load %arg1[%c0, %c0_0] : memref<8x64xf32, #tpu.memory_space<vmem>>, vector<8x64xf32>
    %1 = arith.truncf %0 : vector<8x64xf32> to vector<8x64xbf16>
    %c0_1 = arith.constant 0 : index
    %c0_2 = arith.constant 0 : index
    %2 = vector.load %arg2[%c0_1, %c0_2] : memref<64x32xbf16, #tpu.memory_space<vmem>>, vector<64x32xbf16>
    %cst = arith.constant dense<0.000000e+00> : vector<8x32xf32>
    %3 = tpu.matmul %1, %2, %cst {dimension_numbers = #tpu.dot_dimension_numbers<[1], [0], [0], [1], [0, 0, 1, 1], [], []>} : vector<8x64xbf16>, vector<64x32xbf16>, vector<8x32xf32> -> vector<8x32xf32>
    %c0_3 = arith.constant 0 : index
    %c0_4 = arith.constant 0 : index
    %4 = vector.load %arg3[%c0_3, %c0_4] : memref<1x32xf32, #tpu.memory_space<vmem>>, vector<1x32xf32>
    %5 = vector.broadcast %4 : vector<1x32xf32> to vector<8x32xf32>
    %6 = arith.addf %3, %5 : vector<8x32xf32>
    %7 = vector.extract_strided_slice %6 {offsets = [0, 0], sizes = [8, 16], strides = [1, 1]} : vector<8x32xf32> to vector<8x16xf32>
    %8 = vector.extract_strided_slice %6 {offsets = [0, 16], sizes = [8, 16], strides = [1, 1]} : vector<8x32xf32> to vector<8x16xf32>
    %cst_5 = arith.constant 5.000000e-01 : f32
    %9 = vector.broadcast %cst_5 : f32 to vector<8x16xf32>
    %10 = arith.mulf %9, %8 : vector<8x16xf32>
    %11 = math.exp %10 : vector<8x16xf32>
    %c0_6 = arith.constant 0 : index
    %c0_7 = arith.constant 0 : index
    %12 = vector.load %arg8[%c0_6, %c0_7] : memref<8x16xf32, #tpu.memory_space<vmem>>, vector<8x16xf32>
    %13 = arith.mulf %11, %12 : vector<8x16xf32>
    %14 = arith.addf %7, %13 : vector<8x16xf32>
    %15 = arith.truncf %14 : vector<8x16xf32> to vector<8x16xbf16>
    %c0_8 = arith.constant 0 : index
    %c0_9 = arith.constant 0 : index
    %16 = vector.load %arg4[%c0_8, %c0_9] : memref<16x32xbf16, #tpu.memory_space<vmem>>, vector<16x32xbf16>
    %cst_10 = arith.constant dense<0.000000e+00> : vector<8x32xf32>
    %17 = tpu.matmul %15, %16, %cst_10 {dimension_numbers = #tpu.dot_dimension_numbers<[1], [0], [0], [1], [0, 0, 1, 1], [], []>} : vector<8x16xbf16>, vector<16x32xbf16>, vector<8x32xf32> -> vector<8x32xf32>
    %c0_11 = arith.constant 0 : index
    %c0_12 = arith.constant 0 : index
    %18 = vector.load %arg5[%c0_11, %c0_12] : memref<1x32xf32, #tpu.memory_space<vmem>>, vector<1x32xf32>
    %19 = vector.broadcast %18 : vector<1x32xf32> to vector<8x32xf32>
    %20 = arith.addf %17, %19 : vector<8x32xf32>
    %cst_13 = arith.constant 0.000000e+00 : f32
    %21 = vector.broadcast %cst_13 : f32 to vector<8x32xf32>
    %22 = arith.maximumf %20, %21 : vector<8x32xf32>
    %23 = arith.truncf %22 : vector<8x32xf32> to vector<8x32xbf16>
    %c0_14 = arith.constant 0 : index
    %c0_15 = arith.constant 0 : index
    %24 = vector.load %arg6[%c0_14, %c0_15] : memref<32x64xbf16, #tpu.memory_space<vmem>>, vector<32x64xbf16>
    %cst_16 = arith.constant dense<0.000000e+00> : vector<8x64xf32>
    %25 = tpu.matmul %23, %24, %cst_16 {dimension_numbers = #tpu.dot_dimension_numbers<[1], [0], [0], [1], [0, 0, 1, 1], [], []>} : vector<8x32xbf16>, vector<32x64xbf16>, vector<8x64xf32> -> vector<8x64xf32>
    %c0_17 = arith.constant 0 : index
    %c0_18 = arith.constant 0 : index
    %26 = vector.load %arg7[%c0_17, %c0_18] : memref<1x64xf32, #tpu.memory_space<vmem>>, vector<1x64xf32>
    %27 = vector.broadcast %26 : vector<1x64xf32> to vector<8x64xf32>
    %28 = arith.addf %25, %27 : vector<8x64xf32>
    %cst_19 = arith.constant 0.000000e+00 : f32
    %29 = vector.broadcast %cst_19 : f32 to vector<8x32xf32>
    %30 = tpu.concatenate %28, %7, %8, %29 in 1 : vector<8x64xf32>, vector<8x16xf32>, vector<8x16xf32>, vector<8x32xf32> -> vector<8x128xf32>
    %c0_20 = arith.constant 0 : index
    %c0_21 = arith.constant 0 : index
    %31 = vector.load %arg9[%c0_20, %c0_21] : memref<8x128xf32, #tpu.memory_space<vmem>>, vector<8x128xf32>
    tpu.vector_store %arg9[%c0_20, %c0_21], %30 {strides = array<i32>} : memref<8x128xf32, #tpu.memory_space<vmem>>, vector<8x128xf32>,
    return
  }
  func.func @transform_0(%arg0: i32) -> (i32, i32) {
    %c0_i32 = arith.constant 0 : i32
    %c0_i32_0 = arith.constant 0 : i32
    return %arg0, %c0_i32 : i32, i32
  }
  func.func @transform_1(%arg0: i32) -> (i32, i32) {
    %c0_i32 = arith.constant 0 : i32
    %c0_i32_0 = arith.constant 0 : i32
    %c0_i32_1 = arith.constant 0 : i32
    return %c0_i32, %c0_i32_0 : i32, i32
  }
  func.func @transform_2(%arg0: i32) -> (i32, i32) {
    %c0_i32 = arith.constant 0 : i32
    %c0_i32_0 = arith.constant 0 : i32
    %c0_i32_1 = arith.constant 0 : i32
    return %c0_i32, %c0_i32_0 : i32, i32
  }
  func.func @transform_3(%arg0: i32) -> (i32, i32) {
    %c0_i32 = arith.constant 0 : i32
    %c0_i32_0 = arith.constant 0 : i32
    %c0_i32_1 = arith.constant 0 : i32
    return %c0_i32, %c0_i32_0 : i32, i32
  }
  func.func @transform_4(%arg0: i32) -> (i32, i32) {
    %c0_i32 = arith.constant 0 : i32
    %c0_i32_0 = arith.constant 0 : i32
    %c0_i32_1 = arith.constant 0 : i32
    return %c0_i32, %c0_i32_0 : i32, i32
  }
  func.func @transform_5(%arg0: i32) -> (i32, i32) {
    %c0_i32 = arith.constant 0 : i32
    %c0_i32_0 = arith.constant 0 : i32
    %c0_i32_1 = arith.constant 0 : i32
    return %c0_i32, %c0_i32_0 : i32, i32
  }
  func.func @transform_6(%arg0: i32) -> (i32, i32) {
    %c0_i32 = arith.constant 0 : i32
    %c0_i32_0 = arith.constant 0 : i32
    %c0_i32_1 = arith.constant 0 : i32
    return %c0_i32, %c0_i32_0 : i32, i32
  }
  func.func @transform_7(%arg0: i32) -> (i32, i32) {
    %c0_i32 = arith.constant 0 : i32
    %c0_i32_0 = arith.constant 0 : i32
    return %arg0, %c0_i32 : i32, i32
  }
  func.func @transform_8(%arg0: i32) -> (i32, i32) {
    %c0_i32 = arith.constant 0 : i32
    %c0_i32_0 = arith.constant 0 : i32
    return %arg0, %c0_i32 : i32, i32
  }
}

</mosaic_0001>

<bundles_post_ra>
// kernel: tpu_custom_call.1
= control target key start
LH: loop header
LB: loop body
LE: loop exit
PB: predicated region body
PF: predicated region fallthrough
CT: control target
= control target key end

     0   :  { %v371_v1 = vmov 0.0   ;;  %vm372_vm0 = vmmov 0   ;;  %s373_s13 = smov 16   ;;  %s475_s0 = inlined_call_operand.vmem [shape: f32[8,64], index: 0, kind: input, shape index: {}]   ;;  %s476_s1 = inlined_call_operand.vmem [shape: bf16[64,32], index: 1, kind: input, shape index: {}]   ;;  %s477_s2 = inlined_call_operand.vmem [shape: f32[1,32], index: 2, kind: input, shape index: {}]   ;;  %s478_s3 = inlined_call_operand.vmem [shape: bf16[16,32], index: 3, kind: input, shape index: {}]   ;;  %s479_s4 = inlined_call_operand.vmem [shape: f32[1,32], index: 4, kind: input, shape index: {}]   ;;  %s480_s5 = inlined_call_operand.vmem [shape: bf16[32,64], index: 5, kind: input, shape index: {}]   ;;  %s481_s6 = inlined_call_operand.vmem [shape: f32[1,64], index: 6, kind: input, shape index: {}]   ;;  %s482_s7 = inlined_call_operand.vmem [shape: f32[8,16], index: 7, kind: input, shape index: {}]   ;;  %s483_s8 = inlined_call_operand.hbm [shape: f32[8,128], index: 8, kind: output, shape index: {}]  }
   0x1   :  { %v338_v0 = vld [vmem:[%s476_s1] sm:$0xff]   ;;  %306 = vmatprep.subr.bf16.mxu0 %v371_v1  ;;  %318 = vmatprep.subr.bf16.mxu1 %v371_v1  ;;  %v339_v2 = vld [vmem:[%s476_s1 + $0x8] sm:$0xff]   ;;  %v340_v3 = vld [vmem:[%s476_s1 + $0x10] sm:$0xff]  }
   0x2   :  { %307 = vmatpush3.bf16.msra.mxu0 %v338_v0  ;;  %314 = vmatprep.mubr.msk.bf16.mxu0 %vm372_vm0, %v371_v1  ;;  %v119_v4 = vld [vmem:[%s482_s7] sm:$0xff] }
   0x3   :  { %308 = vmatprep.subr.bf16.mxu0 %v371_v1  ;;  %320 = vmatprep.mubr.msk.bf16.mxu1 %vm372_vm0, %v371_v1 }
   0x4   :  { %121 = vrot.lane.b32.xlu0 %v119_v4, %s373_s13 }
   0x6   :  { %309 = vmatpush3.bf16.msra.mxu0 %v339_v2 }
   0x7   :  { %310 = vmatprep.subr.bf16.mxu0 %v371_v1 }
   0x8   :  { %13 = vsyncpa [#allocation3], 0  ;;  %v341_v5 = vld [vmem:[%s476_s1 + $0x18] sm:$0xff]   ;;  %v31_v6 = vld [vmem:[%s475_s0] sm:$0xff]  ;;  %vm72_vm1 = vcmask 523264   ;;  %s374_s1 = smov 64  }
   0x9   :  { %v32_v7 = vpack.c.bf16 %v31_v6, %v31_v6  ;;  %v283_v8 = vld [vmem:[%s477_s2] ss:$0 sm:$0xff]  ;;  %s375_s2 = smov 112   ;;  %vm146_vm2 = vcmask 130048   ;;  %v344_v24 = vld [vmem:[%s480_s5 + $0x8] sm:$0xff]   ;;  %vm215_vm3 = vcmask 261120  }
   0xa   :  { %311 = vmatpush3.bf16.msra.mxu0 %v340_v3  ;;  %v342_v16 = vld [vmem:[%s478_s3] sm:$0xff]   ;;  %vm264_vm4 = vcmask 654336   ;;  %vm266_vm5 = vcmask 785408  }
   0xb   :  { %312 = vmatprep.subr.bf16.mxu0 %v371_v1  ;;  %319 = vmatpush3.bf16.msra.mxu1 %v342_v16  ;;  %v343_v22 = vld [vmem:[%s480_s5] sm:$0xff]   ;;  %s376_s5 = smov [#allocation2]  }
   0xc   :  { %324 = vmatprep.subr.bf16.mxu1 %v371_v1  ;;  %v289_v25 = vld [vmem:[%s479_s4] ss:$0 sm:$0xff]  ;;  %s275_s27 = sshll.u32 %s376_s5, 4  ;;  %s276_s27 = int_to_ptr.vmem [resolvable:$true] %s275_s27 }
   0xd   :  { %v292_v33 = vld [vmem:[%s481_s6] ss:$0 sm:$0xff]  ;;  %s347_s4 = scalar_lea.vmem %s276_s27, 128  ;;  %p352_p1 = scmp.lt.s32.totalorder %s276_s27, %s276_s27 }
   0xe   :  { %313 = vmatpush3.bf16.msra.mxu0 %v341_v5  ;;  %p348_p0 = scmp.ne.s32.totalorder %s276_s27, %s347_s4  ;;  %p353_p2 = scmp.lt.s32.totalorder %s347_s4, %s347_s4 }
  0x10   :  { %p354_p3 = por %p353_p2, %p352_p1 }
  0x11   :  { %315 = vmatmul.mubr.msk.bf16.vlgmr.msra.gmra.mrb[0].mxu0 %vm72_vm1, %v32_v7 }
  0x12   :  { %p355_p4 = pnand %p354_p3, %p348_p0 }
  0x76   :  { %v122_v17 = vpop.permute.xlu0 %121 }
  0xe4   :  { %v110_v9 = vpop.f32.mrb[0].mxu0 }
  0xe5   :  { %v111_v10 = vadd.f32 %v283_v8, %v110_v9  ;;  %v316_v11 = vpop.f32.mrb[1].mxu0 }
  0xe6   :  { %v113_v12 = vpop.f32.mrb[2].mxu0 }
  0xe7   :  { %v116_v13 = vmul.f32 0.5, %v111_v10  ;;  %260 = vrot.lane.b32.xlu1 %v111_v10, %s374_s1  ;;  %v317_v14 = vpop.f32.mrb[3].mxu0 }
  0xe9   :  { %v117_v15 = vmul.f32 1.442695, %v116_v13 }
  0xeb   :  { %345 = vpow2.f32 %v117_v15 }
  0xf5   :  { %v346_v18 = vpop.eup %345 }
  0xf6   :  { %v124_v19 = vmul.f32 %v346_v18, %v122_v17 }
  0xf8   :  { %126 = vrot.lane.b32.xlu0 %v124_v19, %s375_s2 }
 0x159   :  { %v261_v37 = vpop.permute.xlu1 %260 }
 0x16a   :  { %v127_v20 = vpop.permute.xlu0 %126 }
 0x16b   :  { %v129_v21 = vadd.f32 %v127_v20, %v111_v10 }
 0x16d   :  { %v130_v23 = vpack.c.bf16 %v129_v21, %v129_v21 }
 0x16f   :  { %321 = vmatmul.mubr.msk.bf16.vlgmr.msra.gmra.mrb[0].mxu1 %vm146_vm2, %v130_v23 }
 0x170   :  { %325 = vmatpush3.bf16.msra.mxu1 %v343_v22  ;;  %328 = vmatprep.mubr.msk.bf16.mxu1 %vm372_vm0, %v371_v1 }
 0x171   :  { %326 = vmatprep.subr.bf16.mxu1 %v371_v1 }
 0x174   :  { %327 = vmatpush3.bf16.msra.mxu1 %v344_v24 }
 0x242   :  { %v184_v26 = vpop.f32.mrb[0].mxu1 }
 0x243   :  { %v185_v27 = vadd.f32 %v289_v25, %v184_v26  ;;  %v322_v28 = vpop.f32.mrb[1].mxu1 }
 0x244   :  { %v187_v29 = vpop.f32.mrb[2].mxu1 }
 0x245   :  { %v190_v30 = vmax.f32 %v185_v27, 0.0  ;;  %v323_v31 = vpop.f32.mrb[3].mxu1 }
 0x247   :  { %v191_v32 = vpack.c.bf16 %v190_v30, %v190_v30 }
 0x249   :  { %329 = vmatmul.mubr.msk.bf16.vlgmr.msra.gmra.mrb[4].mxu1 %vm215_vm3, %v191_v32 }
 0x31c   :  { %v253_v34 = vpop.f32.mrb[4].mxu1 }
 0x31d   :  { %v254_v35 = vadd.f32 %v292_v33, %v253_v34  ;;  %v330_v36 = vpop.f32.mrb[5].mxu1 }
 0x31e   :  { %v256_v38 = vpop.f32.mrb[6].mxu1 }
 0x31f   :  { %v263_v39 = vsel %vm72_vm1, %v254_v35, %v261_v37  ;;  %v331_v40 = vpop.f32.mrb[7].mxu1 }
 0x320   :  { %v265_v41 = vsel %vm264_vm4, %v263_v39, %v261_v37 }
 0x321   :  { %v267_v42 = vsel %vm266_vm5, %v265_v41, 0.0 }
 0x322   :  { %268 = vst [vmem:[#allocation2] sm:$0xff] %v267_v42 }
 0x323   :  { %358 = shalt.err (!%p355_p4)
}
 0x324   :  { %s359_s29 = scalar_lea.hbm %s483_s8, 128 }
 0x325   :  { %p360_p5 = scmp.ne.s32.totalorder %s483_s8, %s359_s29  ;;  %p363_p6 = scmp.lt.u32.totalorder %s359_s29, %s483_s8 }
 0x327   :  { %p365_p7 = pnand %p363_p6, %p360_p5 }
 0x329   :  { %368 = shalt.err (!%p365_p7)
}
 0x32a   :  { %278 = dma.vmem_to_hbm [thread:$0]  %s276_s27, 128, %s483_s8, [#allocation3]  }
 0x32b   :  { %369 = dma.done.wait [#allocation3], 128  }
 0x32c   :  { %370 = vsyncadd [#allocation3], 4294967168 }
 0x32d   :  { %282 = vsyncpa [#allocation3], 1 }

</bundles_post_ra>
